<compile_context>
chip_gen: v7x
topology: tpu7x:2x2x1
jax: 0.10.0
libtpu: 0.0.40
codegen_flags: <defaults>
</compile_context>

<pallas_src>
import jax
import jax.numpy as jnp
from jax.experimental import pallas as pl
from jax.experimental.pallas import tpu as pltpu


def _affine_kernel(w_ref, b_ref, x_ref, o_ref):
    # w_ref, b_ref: SMEM f32[1] scalars.  x_ref / o_ref: VMEM tiles.
    o_ref[...] = x_ref[...] * w_ref[0] + b_ref[0]


# (N, 1) f32 occupies ~N/8 vregs (512*N bytes) in VMEM; 2048 -> ~1 MiB in +
# ~1 MiB out, comfortably under every generation's scoped-VMEM default.
_SMALL_N_MAX = 2048
# Rows per tile for the lane-dense gridded path: 1024 x 128 x f32 = 512 KiB
# per buffer (~2 MiB with in+out double-buffering) -- ~86% of HBM roofline on
# v6e and portable to v5e (16 MiB scoped) / v7x (64 MiB physical).
_TR = 1024


def _linear_small(x, w_scalar, b_scalar):
    # Single invocation; x kept at its native (N, 1) shape (full-array block).
    # No pad / reshape / slice -> one dispatch total.
    return pl.pallas_call(
        _affine_kernel,
        out_shape=jax.ShapeDtypeStruct(x.shape, x.dtype),
        in_specs=[
            pl.BlockSpec(memory_space=pltpu.MemorySpace.SMEM),  # weight
            pl.BlockSpec(memory_space=pltpu.MemorySpace.SMEM),  # bias
            pl.BlockSpec(memory_space=pltpu.MemorySpace.VMEM),  # x
        ],
        out_specs=pl.BlockSpec(memory_space=pltpu.MemorySpace.VMEM),
    )(w_scalar, b_scalar, x)


def _linear_large(x, w_scalar, b_scalar, n, out_f):
    # Lane-dense (rows, 128) slab + row-tiled grid (double-buffered pipeline).
    chunk = _TR * 128
    npad = ((n + chunk - 1) // chunk) * chunk
    x_slab = jnp.pad(x.reshape(-1), (0, npad - n)).reshape(npad // 128, 128)
    rows = x_slab.shape[0]

    y_slab = pl.pallas_call(
        _affine_kernel,
        out_shape=jax.ShapeDtypeStruct(x_slab.shape, x_slab.dtype),
        grid=(rows // _TR,),
        in_specs=[
            pl.BlockSpec(memory_space=pltpu.MemorySpace.SMEM),   # weight
            pl.BlockSpec(memory_space=pltpu.MemorySpace.SMEM),   # bias
            pl.BlockSpec((_TR, 128), lambda i: (i, 0)),           # x slab tile
        ],
        out_specs=pl.BlockSpec((_TR, 128), lambda i: (i, 0)),
        # Donate the freshly-built padded slab: no fresh output allocation.
        input_output_aliases={2: 0},
        compiler_params=pltpu.CompilerParams(
            dimension_semantics=("parallel",)),
    )(w_scalar, b_scalar, x_slab)

    # Padded tail evaluates to `b` inside the kernel but lands only in the
    # padded slab and is sliced off here, never in user-visible rows.
    return y_slab.reshape(-1)[:n].reshape(n, out_f)


def linear_forward(x, weight, bias):
    """Pallas equivalent of nn.Linear(1, 1).forward(x).

    x:      (N, 1)  float32
    weight: (1, 1)  float32
    bias:   (1,)    float32
    returns (N, 1)  float32
    """
    n, in_f = x.shape
    out_f, w_in_f = weight.shape
    assert in_f == 1 and out_f == 1 and w_in_f == 1, (
        "This kernel specializes nn.Linear(1, 1); wider in/out_features "
        "would require the MXU / accumulator path."
    )

    w_scalar = weight.reshape(1)  # SMEM scalar
    b_scalar = bias.reshape(1)    # SMEM scalar

    if n <= _SMALL_N_MAX:
        return _linear_small(x, w_scalar, b_scalar)
    return _linear_large(x, w_scalar, b_scalar, n, out_f)


if __name__ == "__main__":
    key = jax.random.PRNGKey(0)
    kx, kw, kb, kx2 = jax.random.split(key, 4)

    # Input consistent with the module's usage: x = torch.randn(100, 1) * 10
    N, IN_F, OUT_F = 100, 1, 1
    x = jax.random.normal(kx, (N, IN_F), dtype=jnp.float32) * 10.0

    # Deterministic parameter init mimicking nn.Linear default:
    # uniform(-1/sqrt(in_features), 1/sqrt(in_features)) == uniform(-1, 1).
    bound = 1.0 / jnp.sqrt(jnp.float32(IN_F))
    weight = jax.random.uniform(kw, (OUT_F, IN_F), dtype=jnp.float32,
                                minval=-bound, maxval=bound)
    bias = jax.random.uniform(kb, (OUT_F,), dtype=jnp.float32,
                              minval=-bound, maxval=bound)

    # Small-N path (the module's actual shape).
    y = linear_forward(x, weight, bias)
    y = jax.block_until_ready(y)
    y_ref = x @ weight.T + bias
    assert y.shape == (N, OUT_F)
    assert jnp.allclose(y, y_ref, atol=1e-5, rtol=1e-5)

    # Large-N path (row-tiled, parallel grid) exercised once for coverage.
    N_BIG = 200_000
    x_big = jax.random.normal(kx2, (N_BIG, IN_F), dtype=jnp.float32) * 10.0
    y_big = linear_forward(x_big, weight, bias)
    y_big = jax.block_until_ready(y_big)
    y_big_ref = x_big @ weight.T + bias
    assert y_big.shape == (N_BIG, OUT_F)
    assert jnp.allclose(y_big, y_big_ref, atol=1e-5, rtol=1e-5)

    print("KERNEL_OK")
</pallas_src>

<mosaic_0001>
module attributes {stable_mosaic.version = 11 : i64} {
  func.func @_affine_kernel(%arg0: memref<1xf32, #tpu.memory_space<smem>>, %arg1: memref<1xf32, #tpu.memory_space<smem>>, %arg2: memref<100x1xf32, #tpu.memory_space<vmem>>, %arg3: memref<100x1xf32, #tpu.memory_space<vmem>>) attributes {dimension_semantics = [], scalar_prefetch = 0 : i64, scratch_operands = 0 : i64, tpu.core_type = #tpu.core_type<tc>} {
    %c0 = arith.constant 0 : index
    %c0_0 = arith.constant 0 : index
    %0 = vector.load %arg2[%c0, %c0_0] : memref<100x1xf32, #tpu.memory_space<vmem>>, vector<100x1xf32>
    %c0_1 = arith.constant 0 : index
    %1 = memref.load %arg0[%c0_1] : memref<1xf32, #tpu.memory_space<smem>>
    %2 = vector.broadcast %1 : f32 to vector<100x1xf32>
    %3 = arith.mulf %0, %2 : vector<100x1xf32>
    %c0_2 = arith.constant 0 : index
    %4 = memref.load %arg1[%c0_2] : memref<1xf32, #tpu.memory_space<smem>>
    %5 = vector.broadcast %4 : f32 to vector<100x1xf32>
    %6 = arith.addf %3, %5 : vector<100x1xf32>
    %c0_3 = arith.constant 0 : index
    %c0_4 = arith.constant 0 : index
    %7 = vector.load %arg3[%c0_3, %c0_4] : memref<100x1xf32, #tpu.memory_space<vmem>>, vector<100x1xf32>
    tpu.vector_store %arg3[%c0_3, %c0_4], %6 {strides = array<i32>} : memref<100x1xf32, #tpu.memory_space<vmem>>, vector<100x1xf32>,
    return
  }
}

</mosaic_0001>

<bundles_post_ra>
// kernel: tpu_custom_call.1
= control target key start
LH: loop header
LB: loop body
LE: loop exit
PB: predicated region body
PF: predicated region fallthrough
CT: control target
= control target key end

     0   :  { %vm59_vm0 = vcmask 7168   ;;  %vm72_vm1 = vcmask 3072   ;;  %s194_s0 = inlined_call_operand.<no memory space> [shape: f32[1], index: 0, kind: input, shape index: {}]   ;;  %s195_s1 = inlined_call_operand.<no memory space> [shape: f32[1], index: 1, kind: input, shape index: {}]   ;;  %s196_s2 = inlined_call_operand.vmem [shape: f32[100,1], index: 2, kind: input, shape index: {}]   ;;  %s197_s3 = inlined_call_operand.vmem [shape: f32[100,1], index: 3, kind: output, shape index: {}]  }
   0x1   :  { %v16_v0 = vld [vmem:[%s196_s2] sm:$0xff]  ;;  %v30_v1 = vstv %s194_s0  ;;  %v45_v2 = vstv %s195_s1  ;;  %v17_v3 = vld [vmem:[%s196_s2 + $0x8] sm:$0xff] }
   0x2   :  { %v31_v4 = vmul.f32 %v30_v1, %v16_v0  ;;  %v32_v5 = vmul.f32 %v30_v1, %v17_v3  ;;  %v18_v6 = vld [vmem:[%s196_s2 + $0x10] sm:$0xff]  ;;  %v19_v7 = vld [vmem:[%s196_s2 + $0x18] sm:$0xff]  ;;  %v20_v8 = vld [vmem:[%s196_s2 + $0x20] sm:$0xff] }
   0x3   :  { %v33_v9 = vmul.f32 %v30_v1, %v18_v6  ;;  %v34_v10 = vmul.f32 %v30_v1, %v19_v7  ;;  %v35_v11 = vmul.f32 %v30_v1, %v20_v8  ;;  %v21_v12 = vld [vmem:[%s196_s2 + $0x28] sm:$0xff]  ;;  %v22_v13 = vld [vmem:[%s196_s2 + $0x30] sm:$0xff]  ;;  %v23_v14 = vld [vmem:[%s196_s2 + $0x38] sm:$0xff] }
   0x4   :  { %v46_v15 = vadd.f32 %v45_v2, %v31_v4  ;;  %v47_v16 = vadd.f32 %v45_v2, %v32_v5  ;;  %v36_v17 = vmul.f32 %v30_v1, %v21_v12  ;;  %v37_v18 = vmul.f32 %v30_v1, %v22_v13  ;;  %v24_v19 = vld [vmem:[%s196_s2 + $0x40] sm:$0xff]  ;;  %v25_v20 = vld [vmem:[%s196_s2 + $0x48] sm:$0xff]  ;;  %v26_v21 = vld [vmem:[%s196_s2 + $0x50] sm:$0xff] }
   0x5   :  { %v48_v22 = vadd.f32 %v45_v2, %v33_v9  ;;  %v49_v23 = vadd.f32 %v45_v2, %v34_v10  ;;  %v50_v24 = vadd.f32 %v45_v2, %v35_v11  ;;  %v38_v25 = vmul.f32 %v30_v1, %v23_v14  ;;  %v27_v26 = vld [vmem:[%s196_s2 + $0x58] sm:$0xff]  ;;  %v28_v27 = vld [vmem:[%s196_s2 + $0x60] sm:$0xf] }
   0x6   :  { %60 = vst.msk [vmem:[%s197_s3] sm:$0xff] %vm59_vm0, %v46_v15  ;;  %61 = vst.msk [vmem:[%s197_s3 + $0x8] sm:$0xff] %vm59_vm0, %v47_v16  ;;  %v51_v28 = vadd.f32 %v45_v2, %v36_v17  ;;  %v52_v29 = vadd.f32 %v45_v2, %v37_v18  ;;  %v39_v30 = vmul.f32 %v30_v1, %v24_v19 }
   0x7   :  { %v40_v31 = vmul.f32 %v30_v1, %v25_v20  ;;  %62 = vst.msk [vmem:[%s197_s3 + $0x10] sm:$0xff] %vm59_vm0, %v48_v22  ;;  %63 = vst.msk [vmem:[%s197_s3 + $0x18] sm:$0xff] %vm59_vm0, %v49_v23  ;;  %v53_v32 = vadd.f32 %v45_v2, %v38_v25  ;;  %v41_v33 = vmul.f32 %v30_v1, %v26_v21 }
   0x8   :  { %64 = vst.msk [vmem:[%s197_s3 + $0x20] sm:$0xff] %vm59_vm0, %v50_v24  ;;  %v42_v34 = vmul.f32 %v30_v1, %v27_v26  ;;  %v43_v35 = vmul.f32 %v30_v1, %v28_v27  ;;  %65 = vst.msk [vmem:[%s197_s3 + $0x28] sm:$0xff] %vm59_vm0, %v51_v28  ;;  %v54_v36 = vadd.f32 %v45_v2, %v39_v30 }
   0x9   :  { %66 = vst.msk [vmem:[%s197_s3 + $0x30] sm:$0xff] %vm59_vm0, %v52_v29  ;;  %v55_v37 = vadd.f32 %v45_v2, %v40_v31  ;;  %67 = vst.msk [vmem:[%s197_s3 + $0x38] sm:$0xff] %vm59_vm0, %v53_v32  ;;  %v56_v38 = vadd.f32 %v45_v2, %v41_v33 }
   0xa   :  { %v57_v39 = vadd.f32 %v45_v2, %v42_v34  ;;  %v58_v40 = vadd.f32 %v45_v2, %v43_v35  ;;  %68 = vst.msk [vmem:[%s197_s3 + $0x40] sm:$0xff] %vm59_vm0, %v54_v36 }
   0xb   :  { %69 = vst.msk [vmem:[%s197_s3 + $0x48] sm:$0xff] %vm59_vm0, %v55_v37  ;;  %70 = vst.msk [vmem:[%s197_s3 + $0x50] sm:$0xff] %vm59_vm0, %v56_v38 }
   0xc   :  { %71 = vst.msk [vmem:[%s197_s3 + $0x58] sm:$0xff] %vm59_vm0, %v57_v39 }
   0xd   :  { %73 = vst.msk [vmem:[%s197_s3 + $0x60] sm:$0xf] %vm72_vm1, %v58_v40 }

</bundles_post_ra>
